<compile_context>
chip_gen: v7x
topology: tpu7x:2x2x1
jax: 0.10.0
libtpu: 0.0.40
codegen_flags: <defaults>
</compile_context>

<pallas_src>
import functools

import jax
import jax.numpy as jnp
from jax.experimental import pallas as pl
from jax.experimental.pallas import tpu as pltpu


def _make_kernel(K, NL, p, neg_slope, training):
    """NL = N * L (lane-dense output width). Static python config baked in."""
    inv_keep = 1.0 / (1.0 - p) if p < 1.0 else 0.0
    thresh = min(int(p * (1 << 32)), (1 << 32) - 1)  # P(keep) = 1 - floor(p*2^32)/2^32

    def kernel(seed_ref, x_ref, w_ref, b_ref, o_ref):
        # x_ref: (C_in, NL + K - 1)   padded, batch folded into lanes
        # w_ref: (C_out, K * C_in)    taps folded into the contraction dim
        # b_ref: (C_out, 1)
        # o_ref: (C_out, NL)
        C_out = o_ref.shape[0]

        # K static lane-shifted views, stacked along sublanes -> one MXU matmul.
        taps = [x_ref[:, k:k + NL] for k in range(K)]          # each (C_in, NL)
        operand = jnp.concatenate(taps, axis=0)                 # (K*C_in, NL)
        acc = jnp.dot(w_ref[...], operand,
                      preferred_element_type=jnp.float32)       # (C_out, NL)
        acc = acc + b_ref[...]                                   # bias broadcast

        # Fused epilogue: leaky_relu * inverted-dropout as one multiplier.
        mult = jnp.where(acc > 0, jnp.float32(1.0), jnp.float32(neg_slope))

        if training and p > 0.0:
            # Counter-based hash PRNG (plain jnp -> lowers on TPU *and* interpret).
            row = jax.lax.broadcasted_iota(jnp.uint32, (C_out, NL), 0)
            col = jax.lax.broadcasted_iota(jnp.uint32, (C_out, NL), 1)
            h = (row * jnp.uint32(NL) + col
                 + pl.program_id(0).astype(jnp.uint32) * jnp.uint32(C_out * NL))
            h = h + seed_ref[0].astype(jnp.uint32) * jnp.uint32(0x9E3779B9)
            h = h ^ (h >> 16)
            h = h * jnp.uint32(0x7FEB352D)
            h = h ^ (h >> 15)
            h = h * jnp.uint32(0x846CA68B)
            h = h ^ (h >> 16)
            keep = h >= jnp.uint32(thresh)                       # P(keep) ~= 1 - p
            mult = mult * jnp.where(keep, jnp.float32(inv_keep), jnp.float32(0.0))

        o_ref[...] = (acc * mult).astype(o_ref.dtype)

    return kernel


@functools.partial(jax.jit, static_argnames=("p", "neg_slope", "training"))
def conv1d_wrapper_forward(x, w, b, seed, *, p=0.2, neg_slope=0.01, training=True):
    """Pallas implementation of Conv1dWrapper.forward.

    x: (N, C_in, L) float32   w: (C_out, C_in, K) float32   b: (C_out,) float32
    seed: (1,) int32 dropout seed (vary it per call/layer for independent masks).
    Returns (N, C_out, L_out) with L_out = L - K + 1.
    """
    N, C_in, L = x.shape
    C_out, _, K = w.shape
    L_out = L - K + 1
    NL = N * L

    # --- layout plumbing (cheap XLA transposes/reshapes, no compute hoisted) ---
    x_flat = jnp.transpose(x, (1, 0, 2)).reshape(C_in, NL)       # batch -> lanes
    x_flat = jnp.pad(x_flat, ((0, 0), (0, K - 1)))               # halo for the taps
    w2 = jnp.transpose(w, (0, 2, 1)).reshape(C_out, K * C_in)    # row k*C_in + i
    b2 = b.reshape(C_out, 1)

    kernel = _make_kernel(K, NL, float(p), float(neg_slope), bool(training))

    cost = pl.CostEstimate(
        flops=2 * N * C_out * C_in * K * L_out,
        transcendentals=0,
        bytes_accessed=4 * (x.size + w.size + b.size + N * C_out * L_out),
    )

    y_flat = pl.pallas_call(
        kernel,
        out_shape=jax.ShapeDtypeStruct((C_out, NL), x.dtype),
        grid_spec=pltpu.PrefetchScalarGridSpec(
            num_scalar_prefetch=1,            # seed lands in SMEM
            grid=(1,),                        # whole (tiny) problem in one step:
                                              # no per-batch grid overhead
            in_specs=[
                pl.BlockSpec((C_in, NL + K - 1), lambda i, sref: (0, 0)),
                pl.BlockSpec((C_out, K * C_in), lambda i, sref: (0, 0)),
                pl.BlockSpec((C_out, 1), lambda i, sref: (0, 0)),
            ],
            out_specs=pl.BlockSpec((C_out, NL), lambda i, sref: (0, 0)),
        ),
        compiler_params=pltpu.CompilerParams(dimension_semantics=("arbitrary",)),
        cost_estimate=cost,
    )(seed, x_flat, w2, b2)

    # Unfold lanes: (C_out, N*L) -> (N, C_out, L_out).  The last K-1 columns per
    # batch element are conv-tail garbage (cross-batch / zero-pad) and are dropped.
    y = y_flat.reshape(C_out, N, L).transpose(1, 0, 2)[:, :, :L_out]
    return y


def _reference_no_dropout(x, w, b, neg_slope=0.01):
    y = jax.lax.conv_general_dilated(
        x, w, window_strides=(1,), padding="VALID",
        dimension_numbers=("NCH", "OIH", "NCH"),
    ) + b[None, :, None]
    return jnp.where(y > 0, y, neg_slope * y)


if __name__ == "__main__":
    # Shapes consistent with Conv1dWrapper(input_shape=4, output_shape=8, filter_length=3)
    N, C_in, C_out, L, K = 2, 4, 8, 16, 3
    p = 0.2

    key = jax.random.PRNGKey(0)
    kx, kw, kb = jax.random.split(key, 3)
    x = jax.random.normal(kx, (N, C_in, L), dtype=jnp.float32)
    bound = 1.0 / (C_in * K) ** 0.5
    w = jax.random.uniform(kw, (C_out, C_in, K), minval=-bound, maxval=bound,
                           dtype=jnp.float32)
    b = jax.random.uniform(kb, (C_out,), minval=-bound, maxval=bound, dtype=jnp.float32)
    seed = jnp.array([42], dtype=jnp.int32)

    # 1) Conv + bias + leaky_relu path (dropout off) vs XLA reference.
    y_eval = conv1d_wrapper_forward(x, w, b, seed, p=p, training=False)
    y_ref = _reference_no_dropout(x, w, b)
    jax.block_until_ready(y_eval)
    assert y_eval.shape == (N, C_out, L - K + 1)
    assert jnp.allclose(y_eval, y_ref, atol=1e-5, rtol=1e-5), "mismatch vs reference"

    # 2) Full forward (F.dropout default training=True): every element must be
    #    either exactly 0 (dropped) or ref/(1-p) (kept), with keep-rate near 1-p.
    y_train = conv1d_wrapper_forward(x, w, b, seed, p=p, training=True)
    jax.block_until_ready(y_train)
    assert y_train.shape == (N, C_out, L - K + 1)
    kept = jnp.abs(y_train) > 0
    scaled_ref = y_ref / (1.0 - p)
    match = jnp.where(kept,
                      jnp.abs(y_train - scaled_ref) <= 1e-4 + 1e-4 * jnp.abs(scaled_ref),
                      True)
    assert bool(jnp.all(match)), "dropout-kept values do not match scaled reference"
    frac = float(jnp.mean(kept.astype(jnp.float32)))
    assert 0.55 < frac < 0.97, f"dropout keep fraction {frac} implausible for p={p}"

    print("KERNEL_OK")
</pallas_src>

<mosaic_0001>
module attributes {stable_mosaic.version = 11 : i64} {
  func.func @kernel(%arg0: i32, %arg1: memref<1xi32, #tpu.memory_space<smem>>, %arg2: memref<4x34xf32, #tpu.memory_space<vmem>>, %arg3: memref<8x12xf32, #tpu.memory_space<vmem>>, %arg4: memref<8x1xf32, #tpu.memory_space<vmem>>, %arg5: memref<8x32xf32, #tpu.memory_space<vmem>>) attributes {dimension_semantics = [#tpu.dimension_semantics<arbitrary>], iteration_bounds = array<i64: 1>, scalar_prefetch = 1 : i64, scratch_operands = 0 : i64, tpu.core_type = #tpu.core_type<tc>, window_params = [{pipeline_mode = #tpu.pipeline_mode<synchronous>, transform_indices = @transform_0, window_bounds = array<i64: 4, 34>}, {pipeline_mode = #tpu.pipeline_mode<synchronous>, transform_indices = @transform_1, window_bounds = array<i64: 8, 12>}, {pipeline_mode = #tpu.pipeline_mode<synchronous>, transform_indices = @transform_2, window_bounds = array<i64: 8, 1>}, {pipeline_mode = #tpu.pipeline_mode<synchronous>, transform_indices = @transform_3, window_bounds = array<i64: 8, 32>}]} {
    %c0 = arith.constant 0 : index
    %c0_0 = arith.constant 0 : index
    %0 = vector.load %arg2[%c0, %c0_0] : memref<4x34xf32, #tpu.memory_space<vmem>>, vector<4x32xf32>
    %c0_1 = arith.constant 0 : index
    %c1 = arith.constant 1 : index
    %1 = vector.load %arg2[%c0_1, %c1] : memref<4x34xf32, #tpu.memory_space<vmem>>, vector<4x32xf32>
    %c0_2 = arith.constant 0 : index
    %c2 = arith.constant 2 : index
    %2 = vector.load %arg2[%c0_2, %c2] : memref<4x34xf32, #tpu.memory_space<vmem>>, vector<4x32xf32>
    %3 = tpu.concatenate %0, %1, %2 in 0 : vector<4x32xf32>, vector<4x32xf32>, vector<4x32xf32> -> vector<12x32xf32>
    %c0_3 = arith.constant 0 : index
    %c0_4 = arith.constant 0 : index
    %4 = vector.load %arg3[%c0_3, %c0_4] : memref<8x12xf32, #tpu.memory_space<vmem>>, vector<8x12xf32>
    %cst = arith.constant dense<0.000000e+00> : vector<8x32xf32>
    %5 = tpu.matmul %4, %3, %cst {dimension_numbers = #tpu.dot_dimension_numbers<[1], [0], [0], [1], [0, 0, 1, 1], [], []>} : vector<8x12xf32>, vector<12x32xf32>, vector<8x32xf32> -> vector<8x32xf32>
    %c0_5 = arith.constant 0 : index
    %c0_6 = arith.constant 0 : index
    %6 = vector.load %arg4[%c0_5, %c0_6] : memref<8x1xf32, #tpu.memory_space<vmem>>, vector<8x1xf32>
    %7 = vector.broadcast %6 : vector<8x1xf32> to vector<8x32xf32>
    %8 = arith.addf %5, %7 : vector<8x32xf32>
    %cst_7 = arith.constant 0.000000e+00 : f32
    %9 = vector.broadcast %cst_7 : f32 to vector<8x32xf32>
    %10 = arith.cmpf ogt, %8, %9 : vector<8x32xf32>
    %cst_8 = arith.constant 1.000000e+00 : f32
    %cst_9 = arith.constant 0.00999999977 : f32
    %11 = vector.broadcast %cst_8 : f32 to vector<8x32xf32>
    %12 = vector.broadcast %cst_9 : f32 to vector<8x32xf32>
    %13 = arith.select %10, %11, %12 : vector<8x32xi1>, vector<8x32xf32>
    %14 = arith.mulf %8, %13 : vector<8x32xf32>
    %c0_10 = arith.constant 0 : index
    %c0_11 = arith.constant 0 : index
    %15 = vector.load %arg5[%c0_10, %c0_11] : memref<8x32xf32, #tpu.memory_space<vmem>>, vector<8x32xf32>
    tpu.vector_store %arg5[%c0_10, %c0_11], %14 {strides = array<i32>} : memref<8x32xf32, #tpu.memory_space<vmem>>, vector<8x32xf32>,
    return
  }
  func.func @transform_0(%arg0: i32, %arg1: memref<1xi32, #tpu.memory_space<smem>>) -> (i32, i32) {
    %c0_i32 = arith.constant 0 : i32
    %c0_i32_0 = arith.constant 0 : i32
    %c0_i32_1 = arith.constant 0 : i32
    return %c0_i32, %c0_i32_0 : i32, i32
  }
  func.func @transform_1(%arg0: i32, %arg1: memref<1xi32, #tpu.memory_space<smem>>) -> (i32, i32) {
    %c0_i32 = arith.constant 0 : i32
    %c0_i32_0 = arith.constant 0 : i32
    %c0_i32_1 = arith.constant 0 : i32
    return %c0_i32, %c0_i32_0 : i32, i32
  }
  func.func @transform_2(%arg0: i32, %arg1: memref<1xi32, #tpu.memory_space<smem>>) -> (i32, i32) {
    %c0_i32 = arith.constant 0 : i32
    %c0_i32_0 = arith.constant 0 : i32
    %c0_i32_1 = arith.constant 0 : i32
    return %c0_i32, %c0_i32_0 : i32, i32
  }
  func.func @transform_3(%arg0: i32, %arg1: memref<1xi32, #tpu.memory_space<smem>>) -> (i32, i32) {
    %c0_i32 = arith.constant 0 : i32
    %c0_i32_0 = arith.constant 0 : i32
    %c0_i32_1 = arith.constant 0 : i32
    return %c0_i32, %c0_i32_0 : i32, i32
  }
}

</mosaic_0001>

<bundles_post_ra>
// kernel: conv1d_wrapper_forward.1
= control target key start
LH: loop header
LB: loop body
LE: loop exit
PB: predicated region body
PF: predicated region fallthrough
CT: control target
= control target key end

     0   :  { %v144_v1 = vmov 0.0|0.0   ;;  %vm145_vm0 = vmmov 0   ;;  %v146_v3 = vmov 0.0   ;;  %v147_v4 = vmov 0   ;;  %s148_s18 = smov 127   ;;  %s149_s19 = smov 126   ;;  %s189_s1 = inlined_call_operand.vmem [shape: f32[4,34], index: 1, kind: input, shape index: {}]   ;;  %s190_s0 = inlined_call_operand.<no memory space> [shape: s32[1], index: 0, kind: input, shape index: {}]   ;;  %s191_s3 = inlined_call_operand.vmem [shape: f32[8,1], index: 3, kind: input, shape index: {}]   ;;  %s192_s2 = inlined_call_operand.vmem [shape: f32[8,12], index: 2, kind: input, shape index: {}]   ;;  %s193_s4 = inlined_call_operand.vmem [shape: f32[8,32], index: 4, kind: output, shape index: {}]  }
   0x1   :  { %v16_v0 = vld [vmem:[%s189_s1] sm:$0xf]  ;;  %130 = vmatprep.subr.bf16.mxu0 %v144_v1  ;;  %127 = vmatprep.mubr.msk.f32.mxu0 %vm145_vm0, %v146_v3  ;;  %vm24_vm1 = vcmask 1043456   ;;  %vm150_vm2 = vmmov 1   ;;  %vm33_vm4 = vcmask 97280   ;;  %vm112_vm6 = vcmask 261120  }
   0x2   :  { %v18_v2 = vrot.slane %v16_v0, 4  ;;  %142 = vset.pattern.permute.xlu1 %v147_v4  ;;  %v27_v5 = vld [vmem:[%s191_s3] sm:$0xff]  ;;  %143 = vset.pattern.permute.xlu0 %v147_v4  ;;  %vm132_vm3 = vmpackc.low %vm24_vm1, %vm150_vm2  ;;  %v151_v15 = vmov 0.01  }
   0x3   :  { %30 = vperm.xlu1 %142, %v27_v5   ;;  %v26_v10 = vld [vmem:[%s192_s2] sm:$0xff] }
   0x4   :  { %19 = vrot.lane.b32.xlu0 %v18_v2, %s148_s18 }
   0x8   :  { %22 = vrot.lane.b32.xlu0 %v16_v0, %s149_s19 }
  0x76   :  { %v20_v6 = vpop.permute.xlu0 %19 }
  0x77   :  { %v25_v7 = vsel %vm24_vm1, %v16_v0, %v20_v6 }
  0x7a   :  { %v23_v8 = vpop.permute.xlu0 %22 }
  0x7b   :  { %v131_v9 = vpack.c.bf16 %v23_v8, %v25_v7 }
  0x7d   :  { %133 = vmatpush3.bf16.msk.msra.mxu0 %vm132_vm3, %v131_v9 }
  0x80   :  { %128 = vmatmul.mubr.msk.f32.vlgmr.msra.gmra.mrb[0].mxu0 %vm33_vm4, %v26_v10 }
  0x82   :  { %v31_v11 = vpop.permute.xlu1 %30 }
 0x153   :  { %v105_v12 = vpop.f32.mrb[0].mxu0 }
 0x154   :  { %v106_v13 = vadd.f32 %v105_v12, %v31_v11  ;;  %v129_v14 = vpop.f32.mrb[1].mxu0 }
 0x156   :  { %vm109_vm5 = vcmp.gt.f32.partialorder %v106_v13, 0.0 }
 0x157   :  { %v110_v16 = vsel %vm109_vm5, 1.0, %v151_v15 }
 0x158   :  { %v111_v17 = vmul.f32 %v110_v16, %v106_v13 }
 0x15a   :  { %113 = vst.msk [vmem:[%s193_s4] sm:$0xff] %vm112_vm6, %v111_v17 }

</bundles_post_ra>
